<compile_context>
chip_gen: v6e
topology: v6e:2x2x1
jax: 0.10.0
libtpu: 0.0.40
codegen_flags: <defaults>
</compile_context>

<pallas_src>
import functools

import jax
import jax.numpy as jnp
from jax.experimental import pallas as pl
from jax.experimental.pallas import tpu as pltpu

LANE = 128      # TPU lane width; every feature dim is padded to this once.
SUBLANE = 8


def _round_up(v, m):
    return ((v + m - 1) // m) * m


# ----------------------------- Pallas kernel -------------------------------

def fused_gcn_kernel(a_ref, dis_ref, x_ref, w_ref, b_ref, p_ref, o_ref):
    """Entire GraphGCN forward, fully resident in VMEM.

    Normalization is folded in:  A_hat @ Z == dis * (A @ (dis * Z)),
    so the dense normalized adjacency never exists anywhere.
    """
    a   = a_ref[...]                       # [N, N]        bf16, 0/1 (+ self loops)
    dis = dis_ref[...]                     # [N, 1]        f32,  D^{-1/2}
    w1  = w_ref[0]                         # [128, 128]    bf16
    w2  = w_ref[1]                         # [128, 128]    bf16
    wl  = w_ref[2]                         # [128, 128]    bf16 (W_lin^T, padded)

    # ---- layer 1: h1 = relu(A_hat @ X @ W1 + b1) ----
    xs = (x_ref[...] * dis).astype(jnp.bfloat16)                        # D^-1/2 X
    ax = jnp.dot(a, xs, preferred_element_type=jnp.float32) * dis       # A_hat X
    h1 = jnp.maximum(
        jnp.dot(ax.astype(jnp.bfloat16), w1,
                preferred_element_type=jnp.float32) + b_ref[0:1, :],
        0.0)                                                            # [N, 128]

    # ---- layer 2: h2 = relu(A_hat @ H1 @ W2 + b2) ----
    h1s = (h1 * dis).astype(jnp.bfloat16)                               # D^-1/2 H1
    ah1 = jnp.dot(a, h1s, preferred_element_type=jnp.float32) * dis     # A_hat H1
    h2 = jnp.maximum(
        jnp.dot(ah1.astype(jnp.bfloat16), w2,
                preferred_element_type=jnp.float32) + b_ref[1:2, :],
        0.0)                                                            # [N, 128]

    # ---- global mean pool + final linear (lane-dense [G_pad, 128] store) ----
    pooled = jnp.dot(p_ref[...], h2.astype(jnp.bfloat16),
                     preferred_element_type=jnp.float32)                # [G_pad, 128]
    # NOTE: padded graph rows end up equal to b_lin (harmless; sliced off in JAX).
    o_ref[...] = (jnp.dot(pooled.astype(jnp.bfloat16), wl,
                          preferred_element_type=jnp.float32) + b_ref[2:3, :])


# ------------------------------ JAX glue ------------------------------------

def build_graph_operands(x, edge_index, batch, num_graphs):
    """Unnormalized adjacency (bf16), D^{-1/2} vector, and mean-pool matrix.

    Built scatter-free (one-hot matmuls) so XLA preprocessing stays cheap.
    """
    n = x.shape[0]
    src, dst = edge_index[0], edge_index[1]
    node_ids = jnp.arange(n, dtype=edge_index.dtype)

    # A[i, j] = number of edges j -> i (duplicates accumulate, like PyG scatter-sum).
    dst_oh = (dst[None, :] == node_ids[:, None]).astype(jnp.float32)    # [N, E]
    src_oh = (src[None, :] == node_ids[:, None]).astype(jnp.float32)    # [N, E]
    a = dst_oh @ src_oh.T                                               # [N, N]

    # add_remaining_self_loops: only nodes without an existing self loop.
    has_self = jnp.diagonal(a) > 0
    a = a + jnp.diag(jnp.where(has_self, 0.0, 1.0))

    # Row degree (in-degree + self loop); matches gcn_norm for symmetric graphs.
    deg = a.sum(axis=1)
    dis = jnp.where(deg > 0, jax.lax.rsqrt(deg), 0.0)[:, None]          # [N, 1] f32

    # Mean-pool matrix, padded to a sublane-aligned number of graph rows.
    g_pad = _round_up(max(num_graphs, SUBLANE), SUBLANE)
    graph_ids = jnp.arange(g_pad, dtype=batch.dtype)
    onehot = (batch[None, :] == graph_ids[:, None]).astype(jnp.float32)  # [G_pad, N]
    counts = jnp.maximum(onehot.sum(axis=1, keepdims=True), 1.0)
    pool = onehot / counts

    return a.astype(jnp.bfloat16), dis, pool.astype(jnp.bfloat16)


def init_params(key, in_channels, hidden_channels, out_channels):
    """Kernel-ready parameters: padded and stacked ONCE (not per forward call)."""
    assert max(in_channels, hidden_channels, out_channels) <= LANE
    k1, k2, k3 = jax.random.split(key, 3)
    # Deterministic synthetic weights (shapes from GCNConv / Linear __init__).
    w1 = jax.random.normal(k1, (in_channels, hidden_channels), jnp.float32) * 0.1
    w2 = jax.random.normal(k2, (hidden_channels, hidden_channels), jnp.float32) * 0.1
    # nn.Linear stores weight as (out, in); we keep its transpose for x @ W^T.
    wl = jax.random.normal(k3, (hidden_channels, out_channels), jnp.float32) * 0.1

    w_all = jnp.zeros((3, LANE, LANE), jnp.float32)
    w_all = w_all.at[0, :in_channels, :hidden_channels].set(w1)
    w_all = w_all.at[1, :hidden_channels, :hidden_channels].set(w2)
    w_all = w_all.at[2, :hidden_channels, :out_channels].set(wl)
    b_all = jnp.zeros((3, LANE), jnp.float32)   # b1 / b2 / b_lin (zero-initialized)

    return {"w_all": w_all.astype(jnp.bfloat16), "b_all": b_all}


@functools.partial(jax.jit, static_argnames=("num_graphs", "out_channels"))
def graph_gcn_forward(params, x, edge_index, batch, num_graphs, out_channels):
    n, c_in = x.shape
    a, dis, pool = build_graph_operands(x, edge_index, batch, num_graphs)
    g_pad = pool.shape[0]

    # Lane-dense node features (only per-call padding left; params padded once).
    x_pad = jnp.zeros((n, LANE), jnp.float32).at[:, :c_in].set(x)

    flops = (2 * n * n * LANE * 2                 # two A matmuls
             + 2 * n * LANE * LANE * 2            # two weight matmuls
             + 2 * g_pad * n * LANE               # pooling matmul
             + 2 * g_pad * LANE * LANE)           # final linear
    bytes_accessed = (a.size * 2 + dis.size * 4 + x_pad.size * 4
                      + params["w_all"].size * 2 + params["b_all"].size * 4
                      + pool.size * 2 + g_pad * LANE * 4)

    y_pad = pl.pallas_call(
        fused_gcn_kernel,
        out_shape=jax.ShapeDtypeStruct((g_pad, LANE), jnp.float32),
        in_specs=[pl.BlockSpec(memory_space=pltpu.MemorySpace.VMEM)] * 6,
        out_specs=pl.BlockSpec(memory_space=pltpu.MemorySpace.VMEM),
        cost_estimate=pl.CostEstimate(flops=flops, transcendentals=0,
                                      bytes_accessed=bytes_accessed),
    )(a, dis, x_pad, params["w_all"], params["b_all"], pool)

    return y_pad[:num_graphs, :out_channels]


if __name__ == "__main__":
    key = jax.random.PRNGKey(0)

    in_channels, hidden_channels, out_channels = 4, 32, 8
    num_nodes, num_graphs = 16, 2

    kx, kp = jax.random.split(key)
    x = jax.random.normal(kx, (num_nodes, in_channels), jnp.float32)

    # Two ring graphs of 8 nodes each (undirected edges listed both ways).
    def ring_edges(offset, n):
        src = jnp.arange(n) + offset
        dst = (jnp.arange(n) + 1) % n + offset
        return jnp.stack([jnp.concatenate([src, dst]),
                          jnp.concatenate([dst, src])], axis=0)

    edge_index = jnp.concatenate([ring_edges(0, 8), ring_edges(8, 8)],
                                 axis=1).astype(jnp.int32)
    batch = jnp.concatenate([jnp.zeros(8, jnp.int32), jnp.ones(8, jnp.int32)])

    params = init_params(kp, in_channels, hidden_channels, out_channels)

    out = graph_gcn_forward(params, x, edge_index, batch, num_graphs, out_channels)
    jax.block_until_ready(out)
    assert out.shape == (num_graphs, out_channels)
    print("KERNEL_OK")
</pallas_src>

<mosaic_0001>
module attributes {stable_mosaic.version = 11 : i64} {
  func.func @fused_gcn_kernel(%arg0: memref<16x16xbf16, #tpu.memory_space<vmem>>, %arg1: memref<16x1xf32, #tpu.memory_space<vmem>>, %arg2: memref<16x128xf32, #tpu.memory_space<vmem>>, %arg3: memref<3x128x128xbf16, #tpu.memory_space<vmem>>, %arg4: memref<3x128xf32, #tpu.memory_space<vmem>>, %arg5: memref<8x16xbf16, #tpu.memory_space<vmem>>, %arg6: memref<8x128xf32, #tpu.memory_space<vmem>>) attributes {dimension_semantics = [], scalar_prefetch = 0 : i64, scratch_operands = 0 : i64, tpu.core_type = #tpu.core_type<tc>} {
    %c0 = arith.constant 0 : index
    %c0_0 = arith.constant 0 : index
    %0 = vector.load %arg0[%c0, %c0_0] : memref<16x16xbf16, #tpu.memory_space<vmem>>, vector<16x16xbf16>
    %c0_1 = arith.constant 0 : index
    %c0_2 = arith.constant 0 : index
    %1 = vector.load %arg1[%c0_1, %c0_2] : memref<16x1xf32, #tpu.memory_space<vmem>>, vector<16x1xf32>
    %c0_3 = arith.constant 0 : index
    %c0_4 = arith.constant 0 : index
    %c0_5 = arith.constant 0 : index
    %2 = vector.load %arg3[%c0_3, %c0_4, %c0_5] : memref<3x128x128xbf16, #tpu.memory_space<vmem>>, vector<1x128x128xbf16>
    %3 = vector.shape_cast %2 : vector<1x128x128xbf16> to vector<128x128xbf16>
    %c1 = arith.constant 1 : index
    %c0_6 = arith.constant 0 : index
    %c0_7 = arith.constant 0 : index
    %4 = vector.load %arg3[%c1, %c0_6, %c0_7] : memref<3x128x128xbf16, #tpu.memory_space<vmem>>, vector<1x128x128xbf16>
    %5 = vector.shape_cast %4 : vector<1x128x128xbf16> to vector<128x128xbf16>
    %c2 = arith.constant 2 : index
    %c0_8 = arith.constant 0 : index
    %c0_9 = arith.constant 0 : index
    %6 = vector.load %arg3[%c2, %c0_8, %c0_9] : memref<3x128x128xbf16, #tpu.memory_space<vmem>>, vector<1x128x128xbf16>
    %7 = vector.shape_cast %6 : vector<1x128x128xbf16> to vector<128x128xbf16>
    %c0_10 = arith.constant 0 : index
    %c0_11 = arith.constant 0 : index
    %8 = vector.load %arg2[%c0_10, %c0_11] : memref<16x128xf32, #tpu.memory_space<vmem>>, vector<16x128xf32>
    %9 = vector.broadcast %1 : vector<16x1xf32> to vector<16x128xf32>
    %10 = arith.mulf %8, %9 : vector<16x128xf32>
    %11 = arith.truncf %10 : vector<16x128xf32> to vector<16x128xbf16>
    %cst = arith.constant dense<0.000000e+00> : vector<16x128xf32>
    %12 = tpu.matmul %0, %11, %cst {dimension_numbers = #tpu.dot_dimension_numbers<[1], [0], [0], [1], [0, 0, 1, 1], [], []>} : vector<16x16xbf16>, vector<16x128xbf16>, vector<16x128xf32> -> vector<16x128xf32>
    %13 = vector.broadcast %1 : vector<16x1xf32> to vector<16x128xf32>
    %14 = arith.mulf %12, %13 : vector<16x128xf32>
    %15 = arith.truncf %14 : vector<16x128xf32> to vector<16x128xbf16>
    %cst_12 = arith.constant dense<0.000000e+00> : vector<16x128xf32>
    %16 = tpu.matmul %15, %3, %cst_12 {dimension_numbers = #tpu.dot_dimension_numbers<[1], [0], [0], [1], [0, 0, 1, 1], [], []>} : vector<16x128xbf16>, vector<128x128xbf16>, vector<16x128xf32> -> vector<16x128xf32>
    %c0_13 = arith.constant 0 : index
    %c0_14 = arith.constant 0 : index
    %17 = vector.load %arg4[%c0_13, %c0_14] : memref<3x128xf32, #tpu.memory_space<vmem>>, vector<1x128xf32>
    %18 = vector.broadcast %17 : vector<1x128xf32> to vector<16x128xf32>
    %19 = arith.addf %16, %18 : vector<16x128xf32>
    %cst_15 = arith.constant 0.000000e+00 : f32
    %20 = vector.broadcast %cst_15 : f32 to vector<16x128xf32>
    %21 = arith.maximumf %19, %20 : vector<16x128xf32>
    %22 = vector.broadcast %1 : vector<16x1xf32> to vector<16x128xf32>
    %23 = arith.mulf %21, %22 : vector<16x128xf32>
    %24 = arith.truncf %23 : vector<16x128xf32> to vector<16x128xbf16>
    %cst_16 = arith.constant dense<0.000000e+00> : vector<16x128xf32>
    %25 = tpu.matmul %0, %24, %cst_16 {dimension_numbers = #tpu.dot_dimension_numbers<[1], [0], [0], [1], [0, 0, 1, 1], [], []>} : vector<16x16xbf16>, vector<16x128xbf16>, vector<16x128xf32> -> vector<16x128xf32>
    %26 = vector.broadcast %1 : vector<16x1xf32> to vector<16x128xf32>
    %27 = arith.mulf %25, %26 : vector<16x128xf32>
    %28 = arith.truncf %27 : vector<16x128xf32> to vector<16x128xbf16>
    %cst_17 = arith.constant dense<0.000000e+00> : vector<16x128xf32>
    %29 = tpu.matmul %28, %5, %cst_17 {dimension_numbers = #tpu.dot_dimension_numbers<[1], [0], [0], [1], [0, 0, 1, 1], [], []>} : vector<16x128xbf16>, vector<128x128xbf16>, vector<16x128xf32> -> vector<16x128xf32>
    %c1_18 = arith.constant 1 : index
    %c0_19 = arith.constant 0 : index
    %30 = vector.load %arg4[%c1_18, %c0_19] : memref<3x128xf32, #tpu.memory_space<vmem>>, vector<1x128xf32>
    %31 = vector.broadcast %30 : vector<1x128xf32> to vector<16x128xf32>
    %32 = arith.addf %29, %31 : vector<16x128xf32>
    %cst_20 = arith.constant 0.000000e+00 : f32
    %33 = vector.broadcast %cst_20 : f32 to vector<16x128xf32>
    %34 = arith.maximumf %32, %33 : vector<16x128xf32>
    %c0_21 = arith.constant 0 : index
    %c0_22 = arith.constant 0 : index
    %35 = vector.load %arg5[%c0_21, %c0_22] : memref<8x16xbf16, #tpu.memory_space<vmem>>, vector<8x16xbf16>
    %36 = arith.truncf %34 : vector<16x128xf32> to vector<16x128xbf16>
    %cst_23 = arith.constant dense<0.000000e+00> : vector<8x128xf32>
    %37 = tpu.matmul %35, %36, %cst_23 {dimension_numbers = #tpu.dot_dimension_numbers<[1], [0], [0], [1], [0, 0, 1, 1], [], []>} : vector<8x16xbf16>, vector<16x128xbf16>, vector<8x128xf32> -> vector<8x128xf32>
    %38 = arith.truncf %37 : vector<8x128xf32> to vector<8x128xbf16>
    %cst_24 = arith.constant dense<0.000000e+00> : vector<8x128xf32>
    %39 = tpu.matmul %38, %7, %cst_24 {dimension_numbers = #tpu.dot_dimension_numbers<[1], [0], [0], [1], [0, 0, 1, 1], [], []>} : vector<8x128xbf16>, vector<128x128xbf16>, vector<8x128xf32> -> vector<8x128xf32>
    %c2_25 = arith.constant 2 : index
    %c0_26 = arith.constant 0 : index
    %40 = vector.load %arg4[%c2_25, %c0_26] : memref<3x128xf32, #tpu.memory_space<vmem>>, vector<1x128xf32>
    %41 = vector.broadcast %40 : vector<1x128xf32> to vector<8x128xf32>
    %42 = arith.addf %39, %41 : vector<8x128xf32>
    %c0_27 = arith.constant 0 : index
    %c0_28 = arith.constant 0 : index
    %43 = vector.load %arg6[%c0_27, %c0_28] : memref<8x128xf32, #tpu.memory_space<vmem>>, vector<8x128xf32>
    tpu.vector_store %arg6[%c0_27, %c0_28], %42 {strides = array<i32>} : memref<8x128xf32, #tpu.memory_space<vmem>>, vector<8x128xf32>,
    return
  }
}

</mosaic_0001>

<bundles_post_ra>
// kernel: graph_gcn_forward.1
= control target key start
LH: loop header
LB: loop body
LE: loop exit
PB: predicated region body
PF: predicated region fallthrough
CT: control target
= control target key end

     0   :  { %v732_v0 = vmov 0   ;;  %v733_v2 = vmov 0.0   ;;  %vm734_vm0 = vmmov 0   ;;  %vm98_vm1 = vcmask 130048   ;;  %s926_s1 = inlined_call_operand.vmem [shape: f32[16,1], index: 1, kind: input, shape index: {}]   ;;  %s927_s0 = inlined_call_operand.vmem [shape: bf16[16,16], index: 0, kind: input, shape index: {}]   ;;  %s928_s3 = inlined_call_operand.vmem [shape: bf16[3,128,128], index: 3, kind: input, shape index: {}]   ;;  %s929_s2 = inlined_call_operand.vmem [shape: f32[16,128], index: 2, kind: input, shape index: {}]   ;;  %s930_s4 = inlined_call_operand.vmem [shape: f32[3,128], index: 4, kind: input, shape index: {}]   ;;  %s931_s5 = inlined_call_operand.vmem [shape: bf16[8,16], index: 5, kind: input, shape index: {}]   ;;  %s932_s6 = inlined_call_operand.vmem [shape: f32[8,128], index: 6, kind: output, shape index: {}]  }
   0x1   :  { %706 = vset.pattern.permute.xlu0 %v732_v0  ;;  %v26_v1 = vld [vmem:[%s926_s1] sm:$0xff]  ;;  %625 = vmatprep.subr.bf16.mxu0 %v733_v2  ;;  %v27_v3 = vld [vmem:[%s926_s1 + $0x8] sm:$0xff]  ;;  %v708_v4 = vld [vmem:[%s928_s3 + $0x38] sm:$0xff]  }
   0x2   :  { %82 = vperm.xlu0 %706, %v26_v1   ;;  %631 = vmatprep.subr.bf16.mxu1 %v733_v2  ;;  %v709_v5 = vld [vmem:[%s928_s3 + $0x30] sm:$0xff]   ;;  %v710_v6 = vld [vmem:[%s928_s3 + $0x28] sm:$0xff]   ;;  %v711_v7 = vld [vmem:[%s928_s3 + $0x20] sm:$0xff]  }
   0x3   :  { %627 = vmatprep.mubr.msk.bf16.mxu0 %vm734_vm0, %v733_v2  ;;  %647 = vmatprep.mubr.msk.bf16.mxu1 %vm734_vm0, %v733_v2  ;;  %v712_v8 = vld [vmem:[%s928_s3 + $0x18] sm:$0xff]   ;;  %v713_v9 = vld [vmem:[%s928_s3 + $0x10] sm:$0xff]   ;;  %v78_v11 = vld [vmem:[%s929_s2] sm:$0xff] }
   0x4   :  { %632 = vmatpush3.bf16.msra.mxu1 %v708_v4  ;;  %v79_v12 = vld [vmem:[%s929_s2 + $0x8] sm:$0xff]  ;;  %v707_v17 = vld [vmem:[%s927_s0] sm:$0xff]   ;;  %v716_v39 = vld [vmem:[%s928_s3 + $0x78] sm:$0xff]  }
   0x5   :  { %633 = vmatprep.subr.bf16.mxu1 %v733_v2  ;;  %v714_v18 = vld [vmem:[%s928_s3 + $0x8] sm:$0xff]   ;;  %v715_v19 = vld [vmem:[%s928_s3] sm:$0xff]   ;;  %v717_v40 = vld [vmem:[%s928_s3 + $0x70] sm:$0xff]  }
   0x6   :  { %87 = vperm.xlu0 %706, %v27_v3   ;;  %v563_v27 = vld [vmem:[%s930_s4] ss:$0 sm:$0xff]  ;;  %v718_v41 = vld [vmem:[%s928_s3 + $0x68] sm:$0xff]   ;;  %v720_v43 = vld [vmem:[%s928_s3 + $0x58] sm:$0xff]  }
   0x7   :  { %v719_v42 = vld [vmem:[%s928_s3 + $0x60] sm:$0xff]   ;;  %v721_v44 = vld [vmem:[%s928_s3 + $0x50] sm:$0xff]   ;;  %v722_v45 = vld [vmem:[%s928_s3 + $0x48] sm:$0xff]  }
   0x8   :  { %634 = vmatpush3.bf16.msra.mxu1 %v709_v5  ;;  %v723_v46 = vld [vmem:[%s928_s3 + $0x40] sm:$0xff]   ;;  %v724_v54 = vld [vmem:[%s928_s3 + $0xb8] sm:$0xff]   ;;  %v725_v55 = vld [vmem:[%s928_s3 + $0xb0] sm:$0xff]  }
   0x9   :  { %635 = vmatprep.subr.bf16.mxu1 %v733_v2  ;;  %v726_v56 = vld [vmem:[%s928_s3 + $0xa8] sm:$0xff]   ;;  %v727_v57 = vld [vmem:[%s928_s3 + $0xa0] sm:$0xff]   ;;  %v728_v58 = vld [vmem:[%s928_s3 + $0x98] sm:$0xff]  }
   0xa   :  { %v729_v59 = vld [vmem:[%s928_s3 + $0x90] sm:$0xff]   ;;  %v730_v60 = vld [vmem:[%s928_s3 + $0x88] sm:$0xff]   ;;  %v573_v61 = vld [vmem:[%s930_s4 + $0x1] ss:$0 sm:$0xff] }
   0xc   :  { %636 = vmatpush3.bf16.msra.mxu1 %v710_v6 }
   0xd   :  { %637 = vmatprep.subr.bf16.mxu1 %v733_v2 }
  0x10   :  { %638 = vmatpush3.bf16.msra.mxu1 %v711_v7 }
  0x11   :  { %639 = vmatprep.subr.bf16.mxu1 %v733_v2 }
  0x14   :  { %640 = vmatpush3.bf16.msra.mxu1 %v712_v8  ;;  %v385_v8 = vld [vmem:[%s931_s5] sm:$0xf] }
  0x15   :  { %641 = vmatprep.subr.bf16.mxu1 %v733_v2 }
  0x18   :  { %642 = vmatpush3.bf16.msra.mxu1 %v713_v9 }
  0x19   :  { %643 = vmatprep.subr.bf16.mxu1 %v733_v2 }
  0x1c   :  { %644 = vmatpush3.bf16.msra.mxu1 %v714_v18 }
  0x1d   :  { %645 = vmatprep.subr.bf16.mxu1 %v733_v2 }
  0x20   :  { %646 = vmatpush3.bf16.msra.mxu1 %v715_v19 }
  0x21   :  { %683 = vmatprep.subr.bf16.mxu1 %v733_v2 }
  0x7d   :  { %v806_v10 = vpop.permute.xlu0 %82 }
  0x7e   :  { %v90_v14 = vmul.f32 %v806_v10, %v78_v11 }
  0x81   :  { %v814_v13 = vpop.permute.xlu0 %87 }
  0x82   :  { %v91_v15 = vmul.f32 %v814_v13, %v79_v12 }
  0x84   :  { %v92_v16 = vpack.c.bf16 %v91_v15, %v90_v14  ;;  %v583_v14 = vld [vmem:[%s930_s4 + $0x2] ss:$0 sm:$0xff] }
  0x86   :  { %626 = vmatpush3.bf16.msra.mxu0 %v92_v16 }
  0x87   :  { %651 = vmatprep.subr.bf16.mxu0 %v733_v2 }
  0x89   :  { %628 = vmatmul.mubr.msk.bf16.vlgmr.msra.gmra.mxu0 %vm98_vm1, %v707_v17 }
  0x8a   :  { %653 = vmatprep.mubr.msk.bf16.mxu0 %vm734_vm0, %v733_v2 }
 0x149   :  { %v136_v20 = vpop.f32.mrf.mxu0 }
 0x14a   :  { %v143_v23 = vmul.f32 %v136_v20, %v806_v10 }
 0x14b   :  { %v629_v21 = vpop.f32.mrf.mxu0 }
 0x14d   :  { %v139_v22 = vpop.f32.mrf.mxu0 }
 0x14e   :  { %v144_v24 = vmul.f32 %v139_v22, %v814_v13 }
 0x14f   :  { %v630_v25 = vpop.f32.mrf.mxu0 }
 0x150   :  { %v145_v26 = vpack.c.bf16 %v144_v24, %v143_v23 }
 0x152   :  { %648 = vmatmul.mubr.bf16.vlgmr.msra.gmra.mxu1 %v145_v26 }
 0x153   :  { %699 = vmatprep.mubr.msk.bf16.mxu1 %vm734_vm0, %v733_v2  ;;  %684 = vmatpush3.bf16.msra.mxu1 %v724_v54 }
 0x154   :  { %685 = vmatprep.subr.bf16.mxu1 %v733_v2 }
 0x157   :  { %686 = vmatpush3.bf16.msra.mxu1 %v725_v55 }
 0x158   :  { %687 = vmatprep.subr.bf16.mxu1 %v733_v2 }
 0x15b   :  { %688 = vmatpush3.bf16.msra.mxu1 %v726_v56 }
 0x15c   :  { %689 = vmatprep.subr.bf16.mxu1 %v733_v2 }
 0x15f   :  { %690 = vmatpush3.bf16.msra.mxu1 %v727_v57 }
 0x160   :  { %691 = vmatprep.subr.bf16.mxu1 %v733_v2 }
 0x163   :  { %692 = vmatpush3.bf16.msra.mxu1 %v728_v58 }
 0x164   :  { %693 = vmatprep.subr.bf16.mxu1 %v733_v2 }
 0x167   :  { %694 = vmatpush3.bf16.msra.mxu1 %v729_v59 }
 0x168   :  { %695 = vmatprep.subr.bf16.mxu1 %v733_v2 }
 0x16b   :  { %696 = vmatpush3.bf16.msra.mxu1 %v730_v60 }
 0x16c   :  { %697 = vmatprep.subr.bf16.mxu1 %v733_v2 }
 0x212   :  { %v233_v28 = vpop.f32.mrf.mxu1 }
 0x213   :  { %v234_v29 = vadd.f32 %v563_v27, %v233_v28 }
 0x214   :  { %v649_v30 = vpop.f32.mrf.mxu1 }
 0x215   :  { %v240_v32 = vmax.f32 %v234_v29, 0.0 }
 0x216   :  { %v236_v31 = vpop.f32.mrf.mxu1 }
 0x217   :  { %v237_v33 = vadd.f32 %v563_v27, %v236_v31  ;;  %v242_v36 = vmul.f32 %v240_v32, %v806_v10 }
 0x218   :  { %v650_v34 = vpop.f32.mrf.mxu1 }
 0x219   :  { %v241_v35 = vmax.f32 %v237_v33, 0.0 }
 0x21b   :  { %v243_v37 = vmul.f32 %v241_v35, %v814_v13 }
 0x21d   :  { %v244_v38 = vpack.c.bf16 %v243_v37, %v242_v36 }
 0x21f   :  { %652 = vmatpush3.bf16.msra.mxu0 %v244_v38 }
 0x220   :  { %657 = vmatprep.subr.bf16.mxu0 %v733_v2 }
 0x222   :  { %654 = vmatmul.mubr.msk.bf16.vlgmr.msra.gmra.mxu0 %vm98_vm1, %v707_v17 }
 0x223   :  { %658 = vmatpush3.bf16.msra.mxu0 %v716_v39  ;;  %673 = vmatprep.mubr.msk.bf16.mxu0 %vm734_vm0, %v733_v2 }
 0x224   :  { %659 = vmatprep.subr.bf16.mxu0 %v733_v2 }
 0x227   :  { %660 = vmatpush3.bf16.msra.mxu0 %v717_v40 }
 0x228   :  { %661 = vmatprep.subr.bf16.mxu0 %v733_v2 }
 0x22b   :  { %662 = vmatpush3.bf16.msra.mxu0 %v718_v41 }
 0x22c   :  { %663 = vmatprep.subr.bf16.mxu0 %v733_v2 }
 0x22f   :  { %664 = vmatpush3.bf16.msra.mxu0 %v719_v42 }
 0x230   :  { %665 = vmatprep.subr.bf16.mxu0 %v733_v2 }
 0x233   :  { %666 = vmatpush3.bf16.msra.mxu0 %v720_v43 }
 0x234   :  { %667 = vmatprep.subr.bf16.mxu0 %v733_v2 }
 0x237   :  { %668 = vmatpush3.bf16.msra.mxu0 %v721_v44 }
 0x238   :  { %669 = vmatprep.subr.bf16.mxu0 %v733_v2 }
 0x23b   :  { %670 = vmatpush3.bf16.msra.mxu0 %v722_v45 }
 0x23c   :  { %671 = vmatprep.subr.bf16.mxu0 %v733_v2 }
 0x23f   :  { %672 = vmatpush3.bf16.msra.mxu0 %v723_v46 }
 0x240   :  { %677 = vmatprep.subr.bf16.mxu0 %v733_v2 }
 0x2e2   :  { %v279_v47 = vpop.f32.mrf.mxu0 }
 0x2e3   :  { %v286_v50 = vmul.f32 %v279_v47, %v806_v10 }
 0x2e4   :  { %v655_v48 = vpop.f32.mrf.mxu0 }
 0x2e6   :  { %v282_v49 = vpop.f32.mrf.mxu0 }
 0x2e7   :  { %v287_v51 = vmul.f32 %v282_v49, %v814_v13 }
 0x2e8   :  { %v656_v52 = vpop.f32.mrf.mxu0 }
 0x2e9   :  { %v288_v53 = vpack.c.bf16 %v287_v51, %v286_v50 }
 0x2eb   :  { %674 = vmatmul.mubr.bf16.vlgmr.msra.gmra.mxu0 %v288_v53 }
 0x2ec   :  { %679 = vmatprep.mubr.msk.bf16.mxu0 %vm734_vm0, %v733_v2  ;;  %v731_v2 = vld [vmem:[%s928_s3 + $0x80] sm:$0xff]  }
 0x2ed   :  { %698 = vmatpush3.bf16.msra.mxu1 %v731_v2 }
 0x3ab   :  { %v376_v62 = vpop.f32.mrf.mxu0 }
 0x3ac   :  { %v377_v0 = vadd.f32 %v573_v61, %v376_v62 }
 0x3ad   :  { %v675_v63 = vpop.f32.mrf.mxu0 }
 0x3ae   :  { %v383_v5 = vmax.f32 %v377_v0, 0.0 }
 0x3af   :  { %v379_v1 = vpop.f32.mrf.mxu0 }
 0x3b0   :  { %v380_v3 = vadd.f32 %v573_v61, %v379_v1 }
 0x3b1   :  { %v676_v4 = vpop.f32.mrf.mxu0 }
 0x3b2   :  { %v384_v6 = vmax.f32 %v380_v3, 0.0 }
 0x3b4   :  { %v386_v7 = vpack.c.bf16 %v384_v6, %v383_v5 }
 0x3b6   :  { %678 = vmatpush3.bf16.msra.mxu0 %v386_v7 }
 0x3b9   :  { %680 = vmatmul.mubr.msk.bf16.vlgmr.msra.gmra.mxu0 %vm98_vm1, %v385_v8 }
 0x479   :  { %v424_v9 = vpop.f32.mrf.mxu0 }
 0x47a   :  { %v430_v10 = vpack.c.bf16 %v424_v9, %v424_v9 }
 0x47b   :  { %v681_v11 = vpop.f32.mrf.mxu0 }
 0x47c   :  { %700 = vmatmul.mubr.bf16.vlgmr.msra.gmra.mxu1 %v430_v10 }
 0x47d   :  { %v427_v12 = vpop.f32.mrf.mxu0 }
 0x47f   :  { %v682_v13 = vpop.f32.mrf.mxu0 }
 0x53c   :  { %v518_v15 = vpop.f32.mrf.mxu1 }
 0x53d   :  { %v519_v16 = vadd.f32 %v583_v14, %v518_v15 }
 0x53e   :  { %v701_v17 = vpop.f32.mrf.mxu1 }
 0x53f   :  { %524 = vst [vmem:[%s932_s6] sm:$0xff] %v519_v16 }
 0x540   :  { %v521_v18 = vpop.f32.mrf.mxu1 }
 0x542   :  { %v702_v19 = vpop.f32.mrf.mxu1 }

</bundles_post_ra>
